<compile_context>
chip_gen: v6e
topology: v6e:2x2x1
jax: 0.10.0
libtpu: 0.0.40
codegen_flags: <defaults>
</compile_context>

<pallas_src>
import jax
import jax.numpy as jnp
from jax import lax
from jax.experimental import pallas as pl
from jax.experimental.pallas import tpu as pltpu


def _controller_kernel(z_ref, h_ref, wz_ref, wh_ref, b_ref, o_ref):
    # z_ref:  (TB, L)   latent activations tile
    # h_ref:  (TB, R)   recurrent-state activations tile
    # wz_ref: (A, L)    weight[:, :L]   (resident)
    # wh_ref: (A, R)    weight[:, L:]   (resident)
    # b_ref:  (A, 1)    bias            (resident)
    # o_ref:  (A, TB)   transposed, lane-dense output tile
    acc = lax.dot_general(
        wz_ref[...], z_ref[...],
        dimension_numbers=(((1,), (1,)), ((), ())),      # (A,L) x (TB,L) -> (A,TB)
        preferred_element_type=jnp.float32)
    acc += lax.dot_general(
        wh_ref[...], h_ref[...],
        dimension_numbers=(((1,), (1,)), ((), ())),      # (A,R) x (TB,R) -> (A,TB)
        preferred_element_type=jnp.float32)
    o_ref[...] = jnp.tanh(acc + b_ref[...]).astype(o_ref.dtype)


def _pick_batch_tile(B):
    """Largest batch tile such that:
       * TB divides B,
       * TB is a multiple of 128 (lane-dense transposed output, and a legal
         sublane count for f32/bf16 activation tiles),
       * grid has >= 2 steps whenever possible (v7x megacore split).
       Falls back to the whole batch (grid=(1,)) for small/odd B."""
    cap = B // 2 if B >= 256 else B
    for tb in (4096, 2048, 1024, 512, 256, 128):
        if tb <= cap and B % tb == 0:
            return tb
    return B


@jax.jit
def controller_forward(z, h, weight, bias):
    """z: (B, latents), h: (B, recurrents),
    weight: (actions, latents+recurrents)  [PyTorch nn.Linear layout],
    bias: (actions,)  ->  (B, actions)"""
    B, L = z.shape
    Bh, R = h.shape
    A, K = weight.shape
    assert Bh == B and K == L + R and bias.shape == (A,)

    # One-time (tiny) split of the weight in the wrapper so the kernel never
    # does a lane-crossing slice; equivalent to cat([z, h]) @ weight.T.
    wz = weight[:, :L]                                   # (A, L)
    wh = weight[:, L:]                                   # (A, R)
    b2 = bias.reshape(A, 1)                              # lane-broadcast form

    TB = _pick_batch_tile(B)
    grid = (B // TB,)

    itemsize = jnp.dtype(z.dtype).itemsize
    cost = pl.CostEstimate(
        flops=2 * B * K * A,
        transcendentals=B * A,
        bytes_accessed=(z.size + h.size + weight.size + bias.size) * itemsize
        + B * A * itemsize,
    )

    out_t = pl.pallas_call(
        _controller_kernel,
        out_shape=jax.ShapeDtypeStruct((A, B), z.dtype),
        grid=grid,
        in_specs=[
            pl.BlockSpec((TB, L), lambda i: (i, 0)),     # batch-tiled latents
            pl.BlockSpec((TB, R), lambda i: (i, 0)),     # batch-tiled recurrents
            pl.BlockSpec((A, L), lambda i: (0, 0)),      # resident weight half
            pl.BlockSpec((A, R), lambda i: (0, 0)),      # resident weight half
            pl.BlockSpec((A, 1), lambda i: (0, 0)),      # resident bias
        ],
        out_specs=pl.BlockSpec((A, TB), lambda i: (0, i)),   # lane-dense (A, TB)
        compiler_params=pltpu.CompilerParams(
            # batch tiles are independent -> megacore split on v7x
            dimension_semantics=("parallel",)),
        cost_estimate=cost,
    )(z, h, wz, wh, b2)

    # Transpose the tiny (A, B) result back to the module's (B, A) layout.
    return out_t.T


def _ref_forward(z, h, weight, bias):
    cat_in = jnp.concatenate([z, h], axis=1)
    return jnp.tanh(cat_in @ weight.T + bias)


if __name__ == "__main__":
    # Shapes consistent with the module: latents=32, recurrents=32, actions=8.
    # Batch = 256 environments -> TB=128, grid=(2,) so the "parallel" batch
    # axis actually splits across both v7x TensorCores.
    B, LATENTS, RECURRENTS, ACTIONS = 256, 32, 32, 8

    key = jax.random.PRNGKey(0)
    kz, kh, kw, kb = jax.random.split(key, 4)

    z = jax.random.normal(kz, (B, LATENTS), dtype=jnp.float32)
    h = jax.random.normal(kh, (B, RECURRENTS), dtype=jnp.float32)

    # Deterministic nn.Linear-style init: U(-1/sqrt(fan_in), 1/sqrt(fan_in))
    fan_in = LATENTS + RECURRENTS
    bound = 1.0 / (fan_in ** 0.5)
    weight = jax.random.uniform(kw, (ACTIONS, fan_in), jnp.float32, -bound, bound)
    bias = jax.random.uniform(kb, (ACTIONS,), jnp.float32, -bound, bound)

    out = controller_forward(z, h, weight, bias)
    jax.block_until_ready(out)

    ref = _ref_forward(z, h, weight, bias)
    assert out.shape == (B, ACTIONS)
    assert jnp.allclose(out, ref, atol=1e-5, rtol=1e-5)

    print("KERNEL_OK")
</pallas_src>

<mosaic_0001>
module attributes {stable_mosaic.version = 11 : i64} {
  func.func @_controller_kernel(%arg0: i32, %arg1: memref<128x32xf32, #tpu.memory_space<vmem>>, %arg2: memref<128x32xf32, #tpu.memory_space<vmem>>, %arg3: memref<8x32xf32, #tpu.memory_space<vmem>>, %arg4: memref<8x32xf32, #tpu.memory_space<vmem>>, %arg5: memref<8x1xf32, #tpu.memory_space<vmem>>, %arg6: memref<8x128xf32, #tpu.memory_space<vmem>>) attributes {dimension_semantics = [#tpu.dimension_semantics<parallel>], iteration_bounds = array<i64: 2>, scalar_prefetch = 0 : i64, scratch_operands = 0 : i64, tpu.core_type = #tpu.core_type<tc>, window_params = [{transform_indices = @transform_0, window_bounds = array<i64: 128, 32>}, {transform_indices = @transform_1, window_bounds = array<i64: 128, 32>}, {pipeline_mode = #tpu.pipeline_mode<synchronous>, transform_indices = @transform_2, window_bounds = array<i64: 8, 32>}, {pipeline_mode = #tpu.pipeline_mode<synchronous>, transform_indices = @transform_3, window_bounds = array<i64: 8, 32>}, {pipeline_mode = #tpu.pipeline_mode<synchronous>, transform_indices = @transform_4, window_bounds = array<i64: 8, 1>}, {transform_indices = @transform_5, window_bounds = array<i64: 8, 128>}]} {
    %c0 = arith.constant 0 : index
    %c0_0 = arith.constant 0 : index
    %0 = vector.load %arg3[%c0, %c0_0] : memref<8x32xf32, #tpu.memory_space<vmem>>, vector<8x32xf32>
    %c0_1 = arith.constant 0 : index
    %c0_2 = arith.constant 0 : index
    %1 = vector.load %arg1[%c0_1, %c0_2] : memref<128x32xf32, #tpu.memory_space<vmem>>, vector<128x32xf32>
    %cst = arith.constant dense<0.000000e+00> : vector<8x128xf32>
    %2 = tpu.matmul %0, %1, %cst {dimension_numbers = #tpu.dot_dimension_numbers<[1], [1], [0], [0], [0, 0, 1, 0], [], []>} : vector<8x32xf32>, vector<128x32xf32>, vector<8x128xf32> -> vector<8x128xf32>
    %c0_3 = arith.constant 0 : index
    %c0_4 = arith.constant 0 : index
    %3 = vector.load %arg4[%c0_3, %c0_4] : memref<8x32xf32, #tpu.memory_space<vmem>>, vector<8x32xf32>
    %c0_5 = arith.constant 0 : index
    %c0_6 = arith.constant 0 : index
    %4 = vector.load %arg2[%c0_5, %c0_6] : memref<128x32xf32, #tpu.memory_space<vmem>>, vector<128x32xf32>
    %cst_7 = arith.constant dense<0.000000e+00> : vector<8x128xf32>
    %5 = tpu.matmul %3, %4, %cst_7 {dimension_numbers = #tpu.dot_dimension_numbers<[1], [1], [0], [0], [0, 0, 1, 0], [], []>} : vector<8x32xf32>, vector<128x32xf32>, vector<8x128xf32> -> vector<8x128xf32>
    %6 = arith.addf %2, %5 : vector<8x128xf32>
    %c0_8 = arith.constant 0 : index
    %c0_9 = arith.constant 0 : index
    %7 = vector.load %arg5[%c0_8, %c0_9] : memref<8x1xf32, #tpu.memory_space<vmem>>, vector<8x1xf32>
    %8 = vector.broadcast %7 : vector<8x1xf32> to vector<8x128xf32>
    %9 = arith.addf %6, %8 : vector<8x128xf32>
    %10 = math.tanh %9 : vector<8x128xf32>
    %c0_10 = arith.constant 0 : index
    %c0_11 = arith.constant 0 : index
    %11 = vector.load %arg6[%c0_10, %c0_11] : memref<8x128xf32, #tpu.memory_space<vmem>>, vector<8x128xf32>
    tpu.vector_store %arg6[%c0_10, %c0_11], %10 {strides = array<i32>} : memref<8x128xf32, #tpu.memory_space<vmem>>, vector<8x128xf32>,
    return
  }
  func.func @transform_0(%arg0: i32) -> (i32, i32) {
    %c0_i32 = arith.constant 0 : i32
    %c0_i32_0 = arith.constant 0 : i32
    return %arg0, %c0_i32 : i32, i32
  }
  func.func @transform_1(%arg0: i32) -> (i32, i32) {
    %c0_i32 = arith.constant 0 : i32
    %c0_i32_0 = arith.constant 0 : i32
    return %arg0, %c0_i32 : i32, i32
  }
  func.func @transform_2(%arg0: i32) -> (i32, i32) {
    %c0_i32 = arith.constant 0 : i32
    %c0_i32_0 = arith.constant 0 : i32
    %c0_i32_1 = arith.constant 0 : i32
    return %c0_i32, %c0_i32_0 : i32, i32
  }
  func.func @transform_3(%arg0: i32) -> (i32, i32) {
    %c0_i32 = arith.constant 0 : i32
    %c0_i32_0 = arith.constant 0 : i32
    %c0_i32_1 = arith.constant 0 : i32
    return %c0_i32, %c0_i32_0 : i32, i32
  }
  func.func @transform_4(%arg0: i32) -> (i32, i32) {
    %c0_i32 = arith.constant 0 : i32
    %c0_i32_0 = arith.constant 0 : i32
    %c0_i32_1 = arith.constant 0 : i32
    return %c0_i32, %c0_i32_0 : i32, i32
  }
  func.func @transform_5(%arg0: i32) -> (i32, i32) {
    %c0_i32 = arith.constant 0 : i32
    %c0_i32_0 = arith.constant 0 : i32
    return %c0_i32, %arg0 : i32, i32
  }
}

</mosaic_0001>

<bundles_post_ra>
// kernel: controller_forward.1
= control target key start
LH: loop header
LB: loop body
LE: loop exit
PB: predicated region body
PF: predicated region fallthrough
CT: control target
= control target key end

     0   :  { %10 = vsyncpa [#allocation3], 0  ;;  %s1118_s0 = inlined_call_operand.vmem [shape: f32[256,32], index: 0, kind: input, shape index: {}]   ;;  %s1119_s1 = inlined_call_operand.vmem [shape: f32[256,32], index: 1, kind: input, shape index: {}]   ;;  %s1120_s2 = inlined_call_operand.vmem [shape: f32[8,32], index: 2, kind: input, shape index: {}]   ;;  %s1121_s3 = inlined_call_operand.vmem [shape: f32[8,32], index: 3, kind: input, shape index: {}]   ;;  %s1122_s4 = inlined_call_operand.vmem [shape: f32[8,1], index: 4, kind: input, shape index: {}]   ;;  %s1123_s5 = inlined_call_operand.hbm [shape: f32[8,256], index: 5, kind: output, shape index: {}]  }
   0x1   :  { %12 = vsyncpa [#allocation3 + $0x1], 0  ;;  %s910_s18 = smov 0   ;;  %s912_s19 = smov 0  }
   0x2   :  { %s914_s20 = smov 0   ;;  %s916_s21 = smov 0  }
   0x3 LB: > { %s931_s22 = sadd.s32 4294967295, %s874_s21   ;;  %s618_s23 = sadd.s32 4294967294, %s874_s21   ;;  %s874_s21 = sphi %s916_s21, %s1129_s21   ;;  %s870_s20 = sphi %s914_s20, %s1128_s20   ;;  %s866_s19 = sphi %s912_s19, %s1127_s19   ;;  %s862_s18 = sphi %s910_s18, %s1126_s18  }
   0x4   : > { %s935_s24 = sadd.s32 1, %s874_s21   ;;  %s140_s25 = sadd.s32 1, %s870_s20 }
   0x5   : > { %s137_s26 = ssub.s32 %s874_s21, %s935_s24  ;;  %p150_p0 = scmp.ne.s32.totalorder %s870_s20, %s866_s19 }
   0x6   : > { %p138_p1 = scmp.eq.s32.totalorder %s137_s26, 0  ;;  %p151_p2 = scmp.eq.s32.totalorder %s931_s22, 1 }
   0x7   : > { %p156_p3 = scmp.ne.s32.totalorder %s866_s19, %s862_s18  ;;  %p157_p4 = scmp.eq.s32.totalorder %s618_s23, 1 }
   0x8   : > { %s946_s27 = scalar_select %p138_p1, %s870_s20, %s140_s25  }
   0x9   : > { %p948_p5 = por %p151_p2, %p150_p0  ;;  %p952_p6 = por %p157_p4, %p156_p3 }
   0xa   : > { %p621_p7 = scmp.ge.s32.totalorder %s874_s21, 1  ;;  %p202_p8 = scmp.lt.s32.totalorder %s874_s21, 3 }
   0xc   : > { %p203_p9 = pnand %p621_p7, %p202_p8 }
   0xd   : > { %s623_s30 = sshll.u32 (!%p203_p9), %s931_s22, 4  ;;  %s232_s25 = sand.u32 (!%p203_p9), 1, %s866_s19  }
   0xe   : > { %206 = sbr.rel (%p203_p9) target bundleno = 311 (0x137), region = 40  ;;  %p236_p10 = scmp.lt.s32.totalorder (!%p203_p9), %s623_s30, 31 }
   0xf   : > { %s622_s26 = sshll.u32 (!%p203_p9), %s232_s25, 3  ;;  %s879_s13 = smov (!%p203_p9), [#allocation2]  }
  0x10   : > { %s234_s6 = scalar_lea.vmem (!%p203_p9), [#allocation2], %s622_s26 }
  0x11   : > { %s547_s7 = sshll.u32 (!%p203_p9), %s234_s6, 4  ;;  %s548_s7 = int_to_ptr.vmem [resolvable:$true] %s547_s7 }
  0x12   : > { %s814_s12 = scalar_lea.vmem (!%p203_p9), %s548_s7, 128 }
  0x13   : > { %v876_v0 = vmov 0.0   ;;  %v524_v1 = vld [vmem:[%s1122_s4] sm:$0xff]  ;;  %vm877_vm0 = vmmov 0   ;;  %s1131_s30 = smov (!%p236_p10, %s623_s30), 31  ;;  %v878_v2 = vmov 0   ;;  %vm281_vm1 = vcmask 261120   ;;  %p815_p11 = scmp.ne.s32.totalorder %s548_s7, %s814_s12 }
  0x14   : > { %699 = vmatprep.subr.mxu0 %v876_v0  ;;  %734 = vmatprep.subr.mxu1 %v876_v0  ;;  %s624_s8 = sshll.u32 %s1131_s30, 3  ;;  %v264_v35 = vld [vmem:[%s1121_s3] sm:$0xff]  ;;  %s662_s30 = sshll.u32 %s931_s22, 7 }
  0x15   : > { %731 = vmatprep.mubr.msk.f32.mxu0 %vm877_vm0, %v876_v0  ;;  %766 = vmatprep.mubr.msk.f32.mxu1 %vm877_vm0, %v876_v0  ;;  %s969_s11 = scalar_lea.vmem %s1119_s1, %s624_s8  ;;  %s974_s14 = scalar_lea.vmem %s1118_s0, %s624_s8  ;;  %v247_v36 = vld [vmem:[%s1120_s2] sm:$0xff] }
  0x16   : > { %811 = vset.pattern.permute.xlu0 %v878_v2  ;;  %v280_v3 = vld [vmem:[%s969_s11 + $0x78] sm:$0xff]  ;;  %v279_v5 = vld [vmem:[%s969_s11 + $0x70] sm:$0xff]  ;;  %v278_v7 = vld [vmem:[%s969_s11 + $0x68] sm:$0xff]  ;;  %s1083_s10 = scalar_lea.hbm %s1123_s5, %s662_s30  ;;  %p816_p12 = pnand %p815_p11, %p948_p5 }
  0x17   : > { %527 = vperm.xlu0 %811, %v524_v1   ;;  %v263_v4 = vld [vmem:[%s974_s14 + $0x78] sm:$0xff]  ;;  %700 = vmatpush3.xpose.msk.msra.mxu0 %vm281_vm1, %v280_v3  ;;  %v262_v6 = vld [vmem:[%s974_s14 + $0x70] sm:$0xff]  ;;  %v261_v8 = vld [vmem:[%s974_s14 + $0x68] sm:$0xff] }
  0x18   : > { %735 = vmatpush3.xpose.msk.msra.mxu1 %vm281_vm1, %v263_v4  ;;  %701 = vmatprep.subr.mxu0 %v876_v0  ;;  %v277_v9 = vld [vmem:[%s969_s11 + $0x60] sm:$0xff]  ;;  %v276_v11 = vld [vmem:[%s969_s11 + $0x58] sm:$0xff]  ;;  %v275_v13 = vld [vmem:[%s969_s11 + $0x50] sm:$0xff]  ;;  %p817_p13 = pneg %p816_p12 }
  0x19   : > { %736 = vmatprep.subr.mxu1 %v876_v0  ;;  %v260_v10 = vld [vmem:[%s974_s14 + $0x60] sm:$0xff]  ;;  %v259_v12 = vld [vmem:[%s974_s14 + $0x58] sm:$0xff]  ;;  %v258_v14 = vld [vmem:[%s974_s14 + $0x50] sm:$0xff] }
  0x1a   : > { %v274_v15 = vld [vmem:[%s969_s11 + $0x48] sm:$0xff]  ;;  %v273_v17 = vld [vmem:[%s969_s11 + $0x40] sm:$0xff]  ;;  %v272_v19 = vld [vmem:[%s969_s11 + $0x38] sm:$0xff] }
  0x1b   : > { %702 = vmatpush3.xpose.msk.msra.mxu0 %vm281_vm1, %v279_v5  ;;  %v257_v16 = vld [vmem:[%s974_s14 + $0x48] sm:$0xff]  ;;  %v256_v18 = vld [vmem:[%s974_s14 + $0x40] sm:$0xff]  ;;  %v255_v20 = vld [vmem:[%s974_s14 + $0x38] sm:$0xff] }
  0x1c   : > { %737 = vmatpush3.xpose.msk.msra.mxu1 %vm281_vm1, %v262_v6  ;;  %703 = vmatprep.subr.mxu0 %v876_v0  ;;  %v271_v21 = vld [vmem:[%s969_s11 + $0x30] sm:$0xff]  ;;  %v270_v23 = vld [vmem:[%s969_s11 + $0x28] sm:$0xff]  ;;  %v269_v25 = vld [vmem:[%s969_s11 + $0x20] sm:$0xff] }
  0x1d   : > { %738 = vmatprep.subr.mxu1 %v876_v0  ;;  %v254_v22 = vld [vmem:[%s974_s14 + $0x30] sm:$0xff]  ;;  %v253_v24 = vld [vmem:[%s974_s14 + $0x28] sm:$0xff]  ;;  %v252_v26 = vld [vmem:[%s974_s14 + $0x20] sm:$0xff] }
  0x1e   : > { %v268_v27 = vld [vmem:[%s969_s11 + $0x18] sm:$0xff]  ;;  %v267_v29 = vld [vmem:[%s969_s11 + $0x10] sm:$0xff]  ;;  %v266_v31 = vld [vmem:[%s969_s11 + $0x8] sm:$0xff] }
  0x1f   : > { %704 = vmatpush3.xpose.msk.msra.mxu0 %vm281_vm1, %v278_v7  ;;  %v251_v28 = vld [vmem:[%s974_s14 + $0x18] sm:$0xff]  ;;  %v250_v30 = vld [vmem:[%s974_s14 + $0x10] sm:$0xff]  ;;  %v249_v32 = vld [vmem:[%s974_s14 + $0x8] sm:$0xff] }
  0x20   : > { %739 = vmatpush3.xpose.msk.msra.mxu1 %vm281_vm1, %v261_v8  ;;  %705 = vmatprep.subr.mxu0 %v876_v0  ;;  %v265_v33 = vld [vmem:[%s969_s11] sm:$0xff]  ;;  %s534_s11 = scalar_lea.sflag [#allocation3], %s232_s25 }
  0x21   : > { %740 = vmatprep.subr.mxu1 %v876_v0  ;;  %v248_v34 = vld [vmem:[%s974_s14] sm:$0xff]  ;;  %s818_s14 = sshll.u32 %s879_s13, 4  ;;  %s819_s14 = int_to_ptr.vmem [resolvable:$false] %s818_s14 }
  0x22   : > { %s820_s22 = scalar_lea.vmem %s819_s14, 256  ;;  %p821_p0 = scmp.lt.s32.totalorder %s548_s7, %s819_s14 }
  0x23   : > { %706 = vmatpush3.xpose.msk.msra.mxu0 %vm281_vm1, %v277_v9  ;;  %p822_p1 = scmp.lt.s32.totalorder %s820_s22, %s814_s12 }
  0x24   : > { %741 = vmatpush3.xpose.msk.msra.mxu1 %vm281_vm1, %v260_v10  ;;  %707 = vmatprep.subr.mxu0 %v876_v0 }
  0x25   : > { %742 = vmatprep.subr.mxu1 %v876_v0  ;;  %p823_p2 = por %p822_p1, %p821_p0 }
  0x27   : > { %708 = vmatpush3.xpose.msk.msra.mxu0 %vm281_vm1, %v276_v11  ;;  %p824_p3 = pnand %p823_p2, %p817_p13 }
  0x28   : > { %743 = vmatpush3.xpose.msk.msra.mxu1 %vm281_vm1, %v259_v12  ;;  %709 = vmatprep.subr.mxu0 %v876_v0 }
  0x29   : > { %744 = vmatprep.subr.mxu1 %v876_v0 }
  0x2b   : > { %710 = vmatpush3.xpose.msk.msra.mxu0 %vm281_vm1, %v275_v13 }
  0x2c   : > { %745 = vmatpush3.xpose.msk.msra.mxu1 %vm281_vm1, %v258_v14  ;;  %711 = vmatprep.subr.mxu0 %v876_v0 }
  0x2d   : > { %746 = vmatprep.subr.mxu1 %v876_v0 }
  0x2f   : > { %712 = vmatpush3.xpose.msk.msra.mxu0 %vm281_vm1, %v274_v15 }
  0x30   : > { %747 = vmatpush3.xpose.msk.msra.mxu1 %vm281_vm1, %v257_v16  ;;  %713 = vmatprep.subr.mxu0 %v876_v0 }
  0x31   : > { %748 = vmatprep.subr.mxu1 %v876_v0 }
  0x33   : > { %714 = vmatpush3.xpose.msk.msra.mxu0 %vm281_vm1, %v273_v17 }
  0x34   : > { %749 = vmatpush3.xpose.msk.msra.mxu1 %vm281_vm1, %v256_v18  ;;  %715 = vmatprep.subr.mxu0 %v876_v0 }
  0x35   : > { %750 = vmatprep.subr.mxu1 %v876_v0 }
  0x37   : > { %716 = vmatpush3.xpose.msk.msra.mxu0 %vm281_vm1, %v272_v19 }
  0x38   : > { %751 = vmatpush3.xpose.msk.msra.mxu1 %vm281_vm1, %v255_v20  ;;  %717 = vmatprep.subr.mxu0 %v876_v0 }
  0x39   : > { %752 = vmatprep.subr.mxu1 %v876_v0 }
  0x3b   : > { %718 = vmatpush3.xpose.msk.msra.mxu0 %vm281_vm1, %v271_v21 }
  0x3c   : > { %753 = vmatpush3.xpose.msk.msra.mxu1 %vm281_vm1, %v254_v22  ;;  %719 = vmatprep.subr.mxu0 %v876_v0 }
  0x3d   : > { %754 = vmatprep.subr.mxu1 %v876_v0 }
  0x3f   : > { %720 = vmatpush3.xpose.msk.msra.mxu0 %vm281_vm1, %v270_v23 }
  0x40   : > { %755 = vmatpush3.xpose.msk.msra.mxu1 %vm281_vm1, %v253_v24  ;;  %721 = vmatprep.subr.mxu0 %v876_v0 }
  0x41   : > { %756 = vmatprep.subr.mxu1 %v876_v0 }
  0x43   : > { %722 = vmatpush3.xpose.msk.msra.mxu0 %vm281_vm1, %v269_v25 }
  0x44   : > { %757 = vmatpush3.xpose.msk.msra.mxu1 %vm281_vm1, %v252_v26  ;;  %723 = vmatprep.subr.mxu0 %v876_v0 }
  0x45   : > { %758 = vmatprep.subr.mxu1 %v876_v0 }
  0x47   : > { %724 = vmatpush3.xpose.msk.msra.mxu0 %vm281_vm1, %v268_v27 }
  0x48   : > { %759 = vmatpush3.xpose.msk.msra.mxu1 %vm281_vm1, %v251_v28  ;;  %725 = vmatprep.subr.mxu0 %v876_v0 }
  0x49   : > { %760 = vmatprep.subr.mxu1 %v876_v0 }
  0x4b   : > { %726 = vmatpush3.xpose.msk.msra.mxu0 %vm281_vm1, %v267_v29 }
  0x4c   : > { %761 = vmatpush3.xpose.msk.msra.mxu1 %vm281_vm1, %v250_v30  ;;  %727 = vmatprep.subr.mxu0 %v876_v0 }
  0x4d   : > { %762 = vmatprep.subr.mxu1 %v876_v0 }
  0x4f   : > { %728 = vmatpush3.xpose.msk.msra.mxu0 %vm281_vm1, %v266_v31 }
  0x50   : > { %763 = vmatpush3.xpose.msk.msra.mxu1 %vm281_vm1, %v249_v32  ;;  %729 = vmatprep.subr.mxu0 %v876_v0 }
  0x51   : > { %764 = vmatprep.subr.mxu1 %v876_v0 }
  0x53   : > { %730 = vmatpush3.xpose.msk.msra.mxu0 %vm281_vm1, %v265_v33 }
  0x54   : > { %765 = vmatpush3.xpose.msk.msra.mxu1 %vm281_vm1, %v248_v34 }
  0x56   : > { %732 = vmatmul.mubr.msk.f32.vlgmr.msra.gmra.mxu0 %vm281_vm1, %v264_v35 }
  0x57   : > { %767 = vmatmul.mubr.msk.f32.vlgmr.msra.gmra.mxu1 %vm281_vm1, %v247_v36 }
  0x92   : > { %v528_v37 = vpop.permute.xlu0 %527 }
 0x116   : > { %v399_v38 = vpop.f32.mrf.mxu0 }
 0x117   : > { %v520_v39 = vpop.f32.mrf.mxu1 }
 0x118   : > { %v521_v40 = vadd.f32 %v520_v39, %v399_v38  ;;  %v733_v41 = vpop.f32.mrf.mxu0 }
 0x119   : > { %v768_v42 = vpop.f32.mrf.mxu1 }
 0x11a   : > { %v530_v43 = vadd.f32 %v528_v37, %v521_v40 }
 0x11c   : > { %812 = vtanh.f32 %v530_v43 }
 0x129   : > { %v813_v44 = vpop.eup %812 }
 0x12a   : > { %532 = vst [vmem:[%s234_s6] sm:$0xff] %v813_v44 }
 0x12b   : > { %827 = shalt.err (!%p824_p3)
}
 0x12c   : > { %s828_s15 = scalar_lea.hbm %s1083_s10, 128  ;;  %s832_s23 = scalar_lea.hbm %s1123_s5, 256 }
 0x12d   : > { %p829_p4 = scmp.ne.s32.totalorder %s1083_s10, %s828_s15  ;;  %p833_p9 = scmp.lt.s32.totalorder %s1083_s10, %s1123_s5 }
 0x12e   : > { %p834_p10 = scmp.lt.s32.totalorder %s832_s23, %s828_s15 }
 0x12f   : > { %p830_p7 = pnand %p829_p4, %p948_p5 }
 0x130   : > { %p835_p11 = por %p834_p10, %p833_p9 }
 0x131   : > { %p831_p8 = pneg %p830_p7 }
 0x133   : > { %p836_p12 = pnand %p835_p11, %p831_p8 }
 0x135   : > { %839 = shalt.err (!%p836_p12)
}
 0x136   : > { %769 = dma.vmem_to_hbm [thread:$0]  (%p948_p5), %s548_s7, 128, %s1083_s10, %s534_s11  }
 0x137 PF: > { %p775_p13 = scmp.ge.s32.totalorder %s874_s21, 2  ;;  %s559_s30 = sand.u32 1, %s862_s18  }
 0x138   : > { %s560_s6 = scalar_lea.sflag [#allocation3], %s559_s30 }
 0x139   : > { %p772_p0 = pnand %p775_p13, %p952_p6 }
 0x13b   : > { %p773_p1 = pneg %p772_p0 }
 0x13d   : > { %857 = dma.done.wait (%p773_p1), %s560_s6, 128  }
 0x13e   : > { %859 = vsyncadd (%p773_p1), %s560_s6, 4294967168  ;;  %p15_p2 = scmp.ge.s32.totalorder %s935_s24, 4   ;;  %s1126_s18 = smov %s866_s19 }
 0x13f   : > { %s1127_s19 = smov %s870_s20  ;;  %s1128_s20 = smov %s946_s27 }
 0x140   : > { %s1129_s21 = smov %s935_s24  ;;  %17 = sbr.rel (!%p15_p2) target bundleno = 3 (0x3), region = 78 }
 0x145   :  { %565 = vsyncpa [#allocation3], 1 }
 0x146   :  { %567 = vsyncpa [#allocation3 + $0x1], 1 }

</bundles_post_ra>
